<compile_context>
chip_gen: v5e
topology: v5e:2x2
jax: 0.10.0
libtpu: 0.0.40
codegen_flags: <defaults>
</compile_context>

<pallas_src>
import functools

import jax
import jax.numpy as jnp
from jax import lax
from jax.experimental import pallas as pl
from jax.experimental.pallas import tpu as pltpu

_LANES = 128
_FORI_THRESHOLD = 16   # fully unroll chunk loops at/below this trip count


def _fold_chunks(x_ref, sum_acc, max_acc, *, c0, c1, n_full, rem):
    """Fold `n_full` unmasked 128-lane chunks (plus an optional masked tail
    chunk with `rem` valid lanes) of x_ref[:, c0:c1, :] into the accumulator
    slices.  The accumulator slice is carried as a value across the whole
    chunk loop (register-resident for small c1-c0): 1 VMEM load + 1 store."""
    s = sum_acc[:, c0:c1, :]
    m = max_acc[:, c0:c1, :]

    if n_full > 0:
        if n_full <= _FORI_THRESHOLD:
            for j in range(n_full):
                ch = x_ref[:, c0:c1, j * _LANES:(j + 1) * _LANES].astype(jnp.float32)
                s = s + ch
                m = jnp.maximum(m, ch)
        else:
            def body(j, carry):
                sj, mj = carry
                start = pl.multiple_of(j * _LANES, _LANES)
                ch = x_ref[:, c0:c1, pl.ds(start, _LANES)].astype(jnp.float32)
                return sj + ch, jnp.maximum(mj, ch)
            s, m = lax.fori_loop(0, n_full, body, (s, m), unroll=8)

    if rem > 0:
        # Single partially-valid tail chunk: lanes >= rem are garbage (OOB
        # block region) -> mask both the sum and the max paths.
        ch = x_ref[:, c0:c1, n_full * _LANES:(n_full + 1) * _LANES].astype(jnp.float32)
        lane = lax.broadcasted_iota(jnp.int32, ch.shape, 2)
        valid = lane < rem
        s = s + jnp.where(valid, ch, 0.0)
        m = jnp.maximum(m, jnp.where(valid, ch, -jnp.inf))

    sum_acc[:, c0:c1, :] = s
    max_acc[:, c0:c1, :] = m


def _channel_attention_kernel(x_ref, w1_ref, w2_ref, o_ref,
                              sum_acc, max_acc, pool_acc, *,
                              hw_true, hw_blk, num_hw, c_sub):
    # x_ref   : (n_blk, C, hw_blk)  input tile
    # w1_ref  : (Ch, C)             fc1.weight (resident)
    # w2_ref  : (C, Ch)             fc2.weight (resident)
    # o_ref   : (n_blk, 1, C)       sigmoid(fc2(relu(fc1(avg))) + fc2(relu(fc1(max))))
    # sum_acc : (n_blk, C, 128) f32 lane-folded running sum
    # max_acc : (n_blk, C, 128) f32 lane-folded running max
    # pool_acc: (2*n_blk, C)    f32 stacked [avg; max] rows for the fused MLP
    t = pl.program_id(1)
    C = x_ref.shape[1]

    @pl.when(t == 0)
    def _init():
        sum_acc[...] = jnp.zeros_like(sum_acc)
        max_acc[...] = jnp.full_like(max_acc, -jnp.inf)

    # Static tail geometry (hw_true / hw_blk / num_hw are compile-time ints).
    tail_valid = hw_true - (num_hw - 1) * hw_blk      # in (0, hw_blk]
    last_partial = tail_valid < hw_blk

    def fold(block_valid):
        n_full = block_valid // _LANES
        rem = block_valid - n_full * _LANES
        for c0 in range(0, C, c_sub):
            _fold_chunks(x_ref, sum_acc, max_acc,
                         c0=c0, c1=min(C, c0 + c_sub),
                         n_full=n_full, rem=rem)

    if num_hw == 1:
        fold(tail_valid)
    elif not last_partial:
        fold(hw_blk)                                  # every block is full
    else:
        @pl.when(t < num_hw - 1)
        def _steady():
            fold(hw_blk)                              # unmasked steady state

        @pl.when(t == num_hw - 1)
        def _tail():
            fold(tail_valid)                          # masked tail chunks only

    @pl.when(t == num_hw - 1)
    def _finalize():
        nb = sum_acc.shape[0]
        # Single cross-lane (XLU) reduce per batch tile.
        pool_acc[0:nb, :] = jnp.sum(sum_acc[...], axis=-1) * (1.0 / hw_true)
        pool_acc[nb:2 * nb, :] = jnp.max(max_acc[...], axis=-1)

        # Fused fc1 -> ReLU -> fc2 over stacked [avg; max] rows (one MXU pass).
        p = pool_acc[...]                                        # (2*nb, C)
        w1 = w1_ref[...].astype(jnp.float32)                     # (Ch, C)
        w2 = w2_ref[...].astype(jnp.float32)                     # (C, Ch)
        h = lax.dot_general(p, w1, (((1,), (1,)), ((), ())),
                            preferred_element_type=jnp.float32)  # (2*nb, Ch)
        h = jnp.maximum(h, 0.0)
        y = lax.dot_general(h, w2, (((1,), (1,)), ((), ())),
                            preferred_element_type=jnp.float32)  # (2*nb, C)
        logits = y[0:nb] + y[nb:2 * nb]                          # (nb, C)
        out = 1.0 / (1.0 + jnp.exp(-logits))                     # sigmoid
        o_ref[...] = out.reshape(o_ref.shape).astype(o_ref.dtype)


def _largest_divisor_le(n, k):
    k = max(1, min(n, k))
    for d in range(k, 0, -1):
        if n % d == 0:
            return d
    return 1


def _vmem_defaults():
    """Generation-aware (tile budget, vmem limit) in bytes."""
    try:
        cap = int(pltpu.get_tpu_info().vmem_capacity_bytes)
    except Exception:
        cap = 64 * 1024 * 1024                       # conservative: v7x per-TC
    if cap >= 128 * 1024 * 1024:                     # v5e / v6e: 128 MiB VMEM
        return 16 * 1024 * 1024, 64 * 1024 * 1024
    return 12 * 1024 * 1024, 56 * 1024 * 1024        # v7x: 64 MiB VMEM per TC


def channel_attention(x, w1, w2, *, n_blk=None,
                      tile_budget_bytes=None, vmem_limit_bytes=None,
                      max_n_blk=16):
    """CBAM channel attention.

    x : (N, C, H, W) NCHW input
    w1: (Ch, C)  fc1 (1x1 conv) weight, Ch = C // ratio
    w2: (C, Ch)  fc2 (1x1 conv) weight
    Returns (N, C, 1, 1), matching the PyTorch module output.
    """
    N, C, H, W = x.shape
    Ch = w1.shape[0]
    assert w1.shape == (Ch, C) and w2.shape == (C, Ch)
    HW = H * W
    itemsize = jnp.dtype(x.dtype).itemsize

    tb_default, vl_default = _vmem_defaults()
    if tile_budget_bytes is None:
        tile_budget_bytes = tb_default
    if vmem_limit_bytes is None:
        vmem_limit_bytes = vl_default

    # No full-tensor pad (that would add a whole extra HBM round trip).  Only
    # tiny spatial extents (< one vreg row) get padded up to 128 lanes.
    x_flat = x.reshape(N, C, HW)
    if HW < _LANES:
        x_flat = jnp.pad(x_flat, ((0, 0), (0, 0), (0, _LANES - HW)))
    HW_arr = x_flat.shape[2]
    # Largest lane-multiple block that never exceeds the array's spatial dim
    # (edge blocks may still be partial; the kernel masks their tail chunks).
    hw_blk_max = (HW_arr // _LANES) * _LANES

    # Batch packing: for small images pack several per tile so each grid step
    # moves a reasonably sized DMA.  Keep >= 2 batch tiles when N allows so
    # the "parallel" axis can shard across v7x's two TensorCores.
    if n_blk is None:
        full_img_bytes = C * hw_blk_max * itemsize
        cand = max(1, int(tile_budget_bytes) // max(1, full_img_bytes))
        n_blk = _largest_divisor_le(N, min(cand, max_n_blk, N))
        if n_blk == N and N >= 2:
            n_blk = _largest_divisor_le(N, N // 2)
    elif N % n_blk != 0:
        n_blk = 1

    # Spatial tile: largest lane multiple inside the (double-buffered) budget.
    hw_blk = (int(tile_budget_bytes) // (n_blk * C * itemsize)) // _LANES * _LANES
    hw_blk = max(_LANES, min(hw_blk, hw_blk_max))
    num_hw = int(pl.cdiv(HW_arr, hw_blk))

    # Channel sub-tile so accumulator slices stay register-resident across the
    # chunk loop (avoids vreg spill / per-chunk VMEM RMW at large C or n_blk).
    if C % 8 == 0:
        c_sub = min(C, max(8, (64 // n_blk) // 8 * 8))
    else:
        c_sub = C

    kernel = functools.partial(
        _channel_attention_kernel,
        hw_true=HW, hw_blk=hw_blk, num_hw=num_hw, c_sub=c_sub)

    grid = (N // n_blk, num_hw)
    out = pl.pallas_call(
        kernel,
        out_shape=jax.ShapeDtypeStruct((N, 1, C), x.dtype),
        grid_spec=pltpu.PrefetchScalarGridSpec(
            num_scalar_prefetch=0,
            grid=grid,
            in_specs=[
                pl.BlockSpec((n_blk, C, hw_blk), lambda i, t: (i, 0, t)),
                pl.BlockSpec((Ch, C), lambda i, t: (0, 0)),   # resident
                pl.BlockSpec((C, Ch), lambda i, t: (0, 0)),   # resident
            ],
            out_specs=pl.BlockSpec((n_blk, 1, C), lambda i, t: (i, 0, 0)),
            scratch_shapes=[
                pltpu.VMEM((n_blk, C, _LANES), jnp.float32),   # sum accumulator
                pltpu.VMEM((n_blk, C, _LANES), jnp.float32),   # max accumulator
                pltpu.VMEM((2 * n_blk, C), jnp.float32),       # stacked pools
            ],
        ),
        compiler_params=pltpu.CompilerParams(
            dimension_semantics=("parallel", "arbitrary"),
            vmem_limit_bytes=int(vmem_limit_bytes),
        ),
    )(x_flat, w1, w2)
    return out.reshape(N, C, 1, 1)


def _reference(x, w1, w2):
    # Pure-JAX reference mirroring the PyTorch forward.
    xf = x.astype(jnp.float32)
    avg = jnp.mean(xf, axis=(2, 3))                          # (N, C)
    mx = jnp.max(xf, axis=(2, 3))                            # (N, C)

    def mlp(p):
        h = jnp.maximum(p @ w1.T.astype(jnp.float32), 0.0)   # (N, Ch)
        return h @ w2.T.astype(jnp.float32)                  # (N, C)

    out = jax.nn.sigmoid(mlp(avg) + mlp(mx))
    return out.reshape(x.shape[0], x.shape[1], 1, 1).astype(x.dtype)


if __name__ == "__main__":
    key = jax.random.PRNGKey(0)
    kx, k1, k2, kx2, kx3, kx5 = jax.random.split(key, 6)

    def make_weights(C, ratio, ka, kb):
        Ch = max(1, C // ratio)
        w1 = jax.random.normal(ka, (Ch, C), dtype=jnp.float32) * (2.0 / C) ** 0.5
        w2 = jax.random.normal(kb, (C, Ch), dtype=jnp.float32) * (2.0 / Ch) ** 0.5
        return w1, w2

    # Case 1: HW a clean multiple of 128, single spatial step, no masking.
    N, C, H, W = 2, 16, 16, 16
    w1, w2 = make_weights(C, 8, k1, k2)
    x = jax.random.normal(kx, (N, C, H, W), dtype=jnp.float32)
    out = jax.block_until_ready(channel_attention(x, w1, w2))
    ref = _reference(x, w1, w2)
    assert out.shape == (N, C, 1, 1), out.shape
    assert jnp.allclose(out, ref, atol=1e-5, rtol=1e-5), (
        float(jnp.max(jnp.abs(out - ref))))

    # Case 2: ragged spatial (20x20=400) + tiny tile budget -> multi-step
    # reduction with an in-kernel masked tail block (no wrapper-side pad).
    x2 = jax.random.normal(kx2, (N, C, 20, 20), dtype=jnp.float32)
    out2 = jax.block_until_ready(
        channel_attention(x2, w1, w2, tile_budget_bytes=16 * 1024))
    ref2 = _reference(x2, w1, w2)
    assert jnp.allclose(out2, ref2, atol=1e-5, rtol=1e-5), (
        float(jnp.max(jnp.abs(out2 - ref2))))

    # Case 3: larger batch of small images -> batch packing (n_blk > 1) with a
    # ragged spatial extent (12x12=144) and masked tail chunk.
    N3, C3 = 4, 32
    w1b, w2b = make_weights(C3, 8, k1, k2)
    x3 = jax.random.normal(kx3, (N3, C3, 12, 12), dtype=jnp.float32)
    out3 = jax.block_until_ready(channel_attention(x3, w1b, w2b))
    ref3 = _reference(x3, w1b, w2b)
    assert jnp.allclose(out3, ref3, atol=1e-5, rtol=1e-5), (
        float(jnp.max(jnp.abs(out3 - ref3))))

    # Case 4: spatial extent smaller than one vreg row (8x8=64 < 128).
    x4 = jax.random.normal(kx, (2, 16, 8, 8), dtype=jnp.float32)
    out4 = jax.block_until_ready(channel_attention(x4, w1, w2))
    ref4 = _reference(x4, w1, w2)
    assert jnp.allclose(out4, ref4, atol=1e-5, rtol=1e-5), (
        float(jnp.max(jnp.abs(out4 - ref4))))

    # Case 5: larger spatial extent (64x64 = 32 chunks) -> exercises the
    # fori_loop(unroll=8) chunk-fold path.
    x5 = jax.random.normal(kx5, (2, 16, 64, 64), dtype=jnp.float32)
    out5 = jax.block_until_ready(channel_attention(x5, w1, w2))
    ref5 = _reference(x5, w1, w2)
    assert jnp.allclose(out5, ref5, atol=1e-5, rtol=1e-5), (
        float(jnp.max(jnp.abs(out5 - ref5))))

    print("KERNEL_OK")
</pallas_src>

<mosaic_0001>
module attributes {stable_mosaic.version = 11 : i64} {
  func.func @_channel_attention_kernel(%arg0: i32, %arg1: i32, %arg2: memref<1x16x256xf32, #tpu.memory_space<vmem>>, %arg3: memref<2x16xf32, #tpu.memory_space<vmem>>, %arg4: memref<16x2xf32, #tpu.memory_space<vmem>>, %arg5: memref<1x1x16xf32, #tpu.memory_space<vmem>>, %arg6: memref<1x16x128xf32, #tpu.memory_space<vmem>>, %arg7: memref<1x16x128xf32, #tpu.memory_space<vmem>>, %arg8: memref<2x16xf32, #tpu.memory_space<vmem>>) attributes {dimension_semantics = [#tpu.dimension_semantics<parallel>, #tpu.dimension_semantics<arbitrary>], iteration_bounds = array<i64: 2, 1>, scalar_prefetch = 0 : i64, scratch_operands = 3 : i64, tpu.core_type = #tpu.core_type<tc>, window_params = [{transform_indices = @transform_0, window_bounds = array<i64: 1, 16, 256>}, {pipeline_mode = #tpu.pipeline_mode<synchronous>, transform_indices = @transform_1, window_bounds = array<i64: 2, 16>}, {pipeline_mode = #tpu.pipeline_mode<synchronous>, transform_indices = @transform_2, window_bounds = array<i64: 16, 2>}, {transform_indices = @transform_3, window_bounds = array<i64: 1, 1, 16>}]} {
    %c0_i32 = arith.constant 0 : i32
    %0 = arith.cmpi eq, %arg1, %c0_i32 : i32
    %1 = arith.extui %0 : i1 to i32
    %c0_i32_0 = arith.constant 0 : i32
    %2 = arith.cmpi ne, %1, %c0_i32_0 : i32
    scf.if %2 {
      %cst = arith.constant 0.000000e+00 : f32
      %16 = vector.broadcast %cst : f32 to vector<1x16x128xf32>
      %c0_19 = arith.constant 0 : index
      %c0_20 = arith.constant 0 : index
      %c0_21 = arith.constant 0 : index
      %17 = vector.load %arg6[%c0_19, %c0_20, %c0_21] : memref<1x16x128xf32, #tpu.memory_space<vmem>>, vector<1x16x128xf32>
      tpu.vector_store %arg6[%c0_19, %c0_20, %c0_21], %16 {strides = array<i32>} : memref<1x16x128xf32, #tpu.memory_space<vmem>>, vector<1x16x128xf32>,
      %cst_22 = arith.constant 0xFF800000 : f32
      %18 = vector.broadcast %cst_22 : f32 to vector<1x16x128xf32>
      %c0_23 = arith.constant 0 : index
      %c0_24 = arith.constant 0 : index
      %c0_25 = arith.constant 0 : index
      %19 = vector.load %arg7[%c0_23, %c0_24, %c0_25] : memref<1x16x128xf32, #tpu.memory_space<vmem>>, vector<1x16x128xf32>
      tpu.vector_store %arg7[%c0_23, %c0_24, %c0_25], %18 {strides = array<i32>} : memref<1x16x128xf32, #tpu.memory_space<vmem>>, vector<1x16x128xf32>,
    } else {
    }
    %c0 = arith.constant 0 : index
    %c0_1 = arith.constant 0 : index
    %c0_2 = arith.constant 0 : index
    %3 = vector.load %arg6[%c0, %c0_1, %c0_2] : memref<1x16x128xf32, #tpu.memory_space<vmem>>, vector<1x16x128xf32>
    %c0_3 = arith.constant 0 : index
    %c0_4 = arith.constant 0 : index
    %c0_5 = arith.constant 0 : index
    %4 = vector.load %arg7[%c0_3, %c0_4, %c0_5] : memref<1x16x128xf32, #tpu.memory_space<vmem>>, vector<1x16x128xf32>
    %c0_6 = arith.constant 0 : index
    %c0_7 = arith.constant 0 : index
    %c0_8 = arith.constant 0 : index
    %5 = vector.load %arg2[%c0_6, %c0_7, %c0_8] : memref<1x16x256xf32, #tpu.memory_space<vmem>>, vector<1x16x128xf32>
    %6 = arith.addf %3, %5 : vector<1x16x128xf32>
    %7 = arith.maximumf %4, %5 : vector<1x16x128xf32>
    %c0_9 = arith.constant 0 : index
    %c0_10 = arith.constant 0 : index
    %c128 = arith.constant 128 : index
    %8 = vector.load %arg2[%c0_9, %c0_10, %c128] : memref<1x16x256xf32, #tpu.memory_space<vmem>>, vector<1x16x128xf32>
    %9 = arith.addf %6, %8 : vector<1x16x128xf32>
    %10 = arith.maximumf %7, %8 : vector<1x16x128xf32>
    %c0_11 = arith.constant 0 : index
    %c0_12 = arith.constant 0 : index
    %c0_13 = arith.constant 0 : index
    %11 = vector.load %arg6[%c0_11, %c0_12, %c0_13] : memref<1x16x128xf32, #tpu.memory_space<vmem>>, vector<1x16x128xf32>
    tpu.vector_store %arg6[%c0_11, %c0_12, %c0_13], %9 {strides = array<i32>} : memref<1x16x128xf32, #tpu.memory_space<vmem>>, vector<1x16x128xf32>,
    %c0_14 = arith.constant 0 : index
    %c0_15 = arith.constant 0 : index
    %c0_16 = arith.constant 0 : index
    %12 = vector.load %arg7[%c0_14, %c0_15, %c0_16] : memref<1x16x128xf32, #tpu.memory_space<vmem>>, vector<1x16x128xf32>
    tpu.vector_store %arg7[%c0_14, %c0_15, %c0_16], %10 {strides = array<i32>} : memref<1x16x128xf32, #tpu.memory_space<vmem>>, vector<1x16x128xf32>,
    %c0_i32_17 = arith.constant 0 : i32
    %13 = arith.cmpi eq, %arg1, %c0_i32_17 : i32
    %14 = arith.extui %13 : i1 to i32
    %c0_i32_18 = arith.constant 0 : i32
    %15 = arith.cmpi ne, %14, %c0_i32_18 : i32
    scf.if %15 {
      %c0_19 = arith.constant 0 : index
      %c0_20 = arith.constant 0 : index
      %c0_21 = arith.constant 0 : index
      %16 = vector.load %arg6[%c0_19, %c0_20, %c0_21] : memref<1x16x128xf32, #tpu.memory_space<vmem>>, vector<1x16x128xf32>
      %cst = arith.constant dense<0.000000e+00> : vector<1x16xf32>
      %17 = vector.multi_reduction <add>, %16, %cst [2] : vector<1x16x128xf32> to vector<1x16xf32>
      %cst_22 = arith.constant 3.906250e-03 : f32
      %18 = vector.broadcast %cst_22 : f32 to vector<1x16xf32>
      %19 = arith.mulf %17, %18 : vector<1x16xf32>
      %c0_23 = arith.constant 0 : index
      %c0_24 = arith.constant 0 : index
      %20 = vector.load %arg8[%c0_23, %c0_24] : memref<2x16xf32, #tpu.memory_space<vmem>>, vector<1x16xf32>
      tpu.vector_store %arg8[%c0_23, %c0_24], %19 {strides = array<i32>} : memref<2x16xf32, #tpu.memory_space<vmem>>, vector<1x16xf32>,
      %c0_25 = arith.constant 0 : index
      %c0_26 = arith.constant 0 : index
      %c0_27 = arith.constant 0 : index
      %21 = vector.load %arg7[%c0_25, %c0_26, %c0_27] : memref<1x16x128xf32, #tpu.memory_space<vmem>>, vector<1x16x128xf32>
      %cst_28 = arith.constant dense<0xFF800000> : vector<1x16xf32>
      %22 = vector.multi_reduction <maximumf>, %21, %cst_28 [2] : vector<1x16x128xf32> to vector<1x16xf32>
      %c1 = arith.constant 1 : index
      %c0_29 = arith.constant 0 : index
      %23 = vector.load %arg8[%c1, %c0_29] : memref<2x16xf32, #tpu.memory_space<vmem>>, vector<1x16xf32>
      tpu.vector_store %arg8[%c1, %c0_29], %22 {strides = array<i32>} : memref<2x16xf32, #tpu.memory_space<vmem>>, vector<1x16xf32>,
      %c0_30 = arith.constant 0 : index
      %c0_31 = arith.constant 0 : index
      %24 = vector.load %arg8[%c0_30, %c0_31] : memref<2x16xf32, #tpu.memory_space<vmem>>, vector<2x16xf32>
      %c0_32 = arith.constant 0 : index
      %c0_33 = arith.constant 0 : index
      %25 = vector.load %arg3[%c0_32, %c0_33] : memref<2x16xf32, #tpu.memory_space<vmem>>, vector<2x16xf32>
      %c0_34 = arith.constant 0 : index
      %c0_35 = arith.constant 0 : index
      %26 = vector.load %arg4[%c0_34, %c0_35] : memref<16x2xf32, #tpu.memory_space<vmem>>, vector<16x2xf32>
      %cst_36 = arith.constant dense<0.000000e+00> : vector<2x2xf32>
      %27 = tpu.matmul %24, %25, %cst_36 {dimension_numbers = #tpu.dot_dimension_numbers<[1], [1], [0], [0], [0, 0, 1, 0], [], []>} : vector<2x16xf32>, vector<2x16xf32>, vector<2x2xf32> -> vector<2x2xf32>
      %cst_37 = arith.constant 0.000000e+00 : f32
      %28 = vector.broadcast %cst_37 : f32 to vector<2x2xf32>
      %29 = arith.maximumf %27, %28 : vector<2x2xf32>
      %cst_38 = arith.constant dense<0.000000e+00> : vector<2x16xf32>
      %30 = tpu.matmul %29, %26, %cst_38 {dimension_numbers = #tpu.dot_dimension_numbers<[1], [1], [0], [0], [0, 0, 1, 0], [], []>} : vector<2x2xf32>, vector<16x2xf32>, vector<2x16xf32> -> vector<2x16xf32>
      %31 = vector.extract_strided_slice %30 {offsets = [0, 0], sizes = [1, 16], strides = [1, 1]} : vector<2x16xf32> to vector<1x16xf32>
      %32 = vector.extract_strided_slice %30 {offsets = [1, 0], sizes = [1, 16], strides = [1, 1]} : vector<2x16xf32> to vector<1x16xf32>
      %33 = arith.addf %31, %32 : vector<1x16xf32>
      %cst_39 = arith.constant 0.000000e+00 : f32
      %34 = vector.broadcast %cst_39 : f32 to vector<1x16xf32>
      %35 = arith.subf %34, %33 : vector<1x16xf32>
      %36 = math.exp %35 : vector<1x16xf32>
      %cst_40 = arith.constant 1.000000e+00 : f32
      %37 = vector.broadcast %cst_40 : f32 to vector<1x16xf32>
      %38 = arith.addf %37, %36 : vector<1x16xf32>
      %cst_41 = arith.constant 1.000000e+00 : f32
      %39 = vector.broadcast %cst_41 : f32 to vector<1x16xf32>
      %40 = arith.divf %39, %38 : vector<1x16xf32>
      %41 = vector.shape_cast %40 : vector<1x16xf32> to vector<1x1x16xf32>
      %c0_42 = arith.constant 0 : index
      %c0_43 = arith.constant 0 : index
      %c0_44 = arith.constant 0 : index
      %42 = vector.load %arg5[%c0_42, %c0_43, %c0_44] : memref<1x1x16xf32, #tpu.memory_space<vmem>>, vector<1x1x16xf32>
      tpu.vector_store %arg5[%c0_42, %c0_43, %c0_44], %41 {strides = array<i32>} : memref<1x1x16xf32, #tpu.memory_space<vmem>>, vector<1x1x16xf32>,
    } else {
    }
    return
  }
  func.func @transform_0(%arg0: i32, %arg1: i32) -> (i32, i32, i32) {
    %c0_i32 = arith.constant 0 : i32
    %c0_i32_0 = arith.constant 0 : i32
    return %arg0, %c0_i32, %arg1 : i32, i32, i32
  }
  func.func @transform_1(%arg0: i32, %arg1: i32) -> (i32, i32) {
    %c0_i32 = arith.constant 0 : i32
    %c0_i32_0 = arith.constant 0 : i32
    %c0_i32_1 = arith.constant 0 : i32
    return %c0_i32, %c0_i32_0 : i32, i32
  }
  func.func @transform_2(%arg0: i32, %arg1: i32) -> (i32, i32) {
    %c0_i32 = arith.constant 0 : i32
    %c0_i32_0 = arith.constant 0 : i32
    %c0_i32_1 = arith.constant 0 : i32
    return %c0_i32, %c0_i32_0 : i32, i32
  }
  func.func @transform_3(%arg0: i32, %arg1: i32) -> (i32, i32, i32) {
    %c0_i32 = arith.constant 0 : i32
    %c0_i32_0 = arith.constant 0 : i32
    %c0_i32_1 = arith.constant 0 : i32
    return %arg0, %c0_i32, %c0_i32_0 : i32, i32, i32
  }
}

</mosaic_0001>

<bundles_post_ra>
// kernel: tpu_custom_call.1
= control target key start
LH: loop header
LB: loop body
LE: loop exit
PB: predicated region body
PF: predicated region fallthrough
CT: control target
= control target key end

     0   :  { %8 = vsyncpa [#allocation6], 0  ;;  %s806_s0 = inlined_call_operand.hbm [shape: f32[2,16,256], index: 0, kind: input, shape index: {}]   ;;  %s807_s1 = inlined_call_operand.vmem [shape: f32[2,16], index: 1, kind: input, shape index: {}]   ;;  %s808_s2 = inlined_call_operand.vmem [shape: f32[16,2], index: 2, kind: input, shape index: {}]   ;;  %s809_s3 = inlined_call_operand.hbm [shape: f32[2,1,16], index: 3, kind: output, shape index: {}]  }
   0x1   :  { %10 = vsyncpa [#allocation6 + $0x1], 0 }
   0x2   :  { %11 = vsyncpa [#allocation7], 0 }
   0x3   :  { %13 = vsyncpa [#allocation7 + $0x1], 0  ;;  %s668_s12 = smov 0   ;;  %s670_s13 = smov 0  }
   0x4   :  { %s672_s14 = smov 0   ;;  %s674_s15 = smov 0  }
   0x5   :  { %s676_s16 = smov 0   ;;  %s678_s17 = smov 0  }
   0x6 LB: > { %s447_s18 = sadd.s32 4294967295, %s644_s17   ;;  %s448_s19 = sadd.s32 4294967294, %s644_s17   ;;  %s644_s17 = sphi %s678_s17, %s19_s17   ;;  %s640_s16 = sphi %s676_s16, %s818_s16   ;;  %s636_s15 = sphi %s674_s15, %s817_s15   ;;  %s632_s14 = sphi %s672_s14, %s816_s14   ;;  %s628_s13 = sphi %s670_s13, %s815_s13   ;;  %s624_s12 = sphi %s668_s12, %s814_s12  }
   0x7   : > { %s31_s20 = sadd.s32 1, %s640_s16  ;;  %s40_s21 = sadd.s32 1, %s632_s14 }
   0x8   : > { %p33_p0 = scmp.ge.s32.totalorder %s31_s20, 2  ;;  %p47_p1 = scmp.ne.s32.totalorder %s632_s14, %s628_s13 }
   0x9   : > { %p48_p2 = scmp.eq.s32.totalorder %s644_s17, 0  ;;  %p53_p3 = scmp.ne.s32.totalorder %s628_s13, %s624_s12 }
   0xa   : > { %s820_s20 = smov (%p33_p0, %s31_s20), 0  ;;  %p54_p5 = scmp.eq.s32.totalorder %s447_s18, 0 }
   0xb   : > { %p709_p4 = por %p48_p2, %p47_p1  ;;  %s35_s23 = ssub.s32 %s640_s16, %s820_s20 }
   0xc   : > { %p119_p6 = scmp.eq.s32.totalorder %s447_s18, 1  ;;  %p38_p7 = scmp.eq.s32.totalorder %s35_s23, 0 }
   0xd   : > { %p715_p8 = por %p54_p5, %p53_p3  ;;  %p125_p10 = scmp.eq.s32.totalorder %s448_s19, 1 }
   0xe   : > { %p719_p9 = por %p119_p6, %p47_p1  ;;  %p450_p12 = scmp.ge.s32.totalorder %s644_s17, 2 }
   0xf   : > { %s724_s26 = scalar_select %p38_p7, %s632_s14, %s40_s21  }
  0x10   : > { %p726_p11 = por %p125_p10, %p53_p3  ;;  %p476_p13 = scmp.lt.s32.totalorder %s644_s17, 2 }
  0x11   : > { %s151_s28 = sand.u32 1, %s632_s14   ;;  %s463_s30 = sshll.u32 %s640_s16, 5 }
  0x12   : > { %s451_s29 = sshll.u32 %s151_s28, 5  ;;  %s162_s6 = scalar_lea.hbm %s806_s0, %s463_s30 }
  0x13   : > { %s155_s7 = scalar_lea.vmem [#allocation5], %s451_s29  ;;  %s163_s9 = sshll.u32 %s162_s6, 4  ;;  %s164_s9 = int_to_ptr.hbm [resolvable:$true] %s163_s9 }
  0x14   : > { %s165_s8 = sshll.u32 %s155_s7, 4  ;;  %p469_p0 = pnand %p476_p13, %p709_p4  ;;  %s166_s8 = int_to_ptr.vmem [resolvable:$true] %s165_s8 }
  0x15   : > { %p454_p1 = scmp.ge.s32.totalorder %s644_s17, 1  ;;  %s152_s10 = scalar_lea.sflag [#allocation6], %s151_s28 }
  0x16   : > { %s646_s11 = smov 256   ;;  %s647_s18 = smov 16  }
  0x17   : > { %471 = dma.hbm_to_vmem [thread:$0]  (!%p469_p0), %s164_s9, 512, %s166_s8, %s152_s10, %s646_s11, %s646_s11, %s647_s18  }
  0x18   : > { %p173_p2 = scmp.lt.s32.totalorder %s644_s17, 3 }
  0x1a   : > { %p174_p3 = pnand %p454_p1, %p173_p2 }
  0x1b   : > { %s742_s19 = sand.u32 (!%p174_p3), 1, %s628_s13  }
  0x1c   : > { %177 = sbr.rel (%p174_p3) target bundleno = 465 (0x1d1), region = 32  ;;  %s455_s21 = sshll.u32 (!%p174_p3), %s742_s19, 5 }
  0x1d   : > { %s180_s23 = scalar_lea.sflag (!%p174_p3), [#allocation6], %s742_s19  ;;  %s183_s29 = scalar_lea.vmem (!%p174_p3), [#allocation5], %s455_s21 }
  0x21   : > { %615 = dma.done.wait (%p715_p8), %s180_s23, 512  }
  0x22   : > { %617 = vsyncadd (%p715_p8), %s180_s23, 4294966784  ;;  %v219_v0 = vld [vmem:[%s183_s29] sm:$0xff]  ;;  %v225_v1 = vld [vmem:[%s183_s29 + $0x8] sm:$0xff]  ;;  %vm275_vm0 = vcmask 130048   ;;  %vm303_vm1 = vcmask 15360   ;;  %v248_v10 = vlaneseq  ;;  %vm253_vm2 = vcmask 130112   ;;  %s366_s8 = scalar_lea.hbm %s809_s3, %s636_s15 }
  0x23   : > { %v229_v2 = vmax.f32 %v219_v0, %v225_v1  ;;  %v227_v3 = vadd.f32 %v225_v1, %v219_v0  ;;  %v220_v4 = vld [vmem:[%s183_s29 + $0x10] sm:$0xff]  ;;  %v226_v5 = vld [vmem:[%s183_s29 + $0x18] sm:$0xff]  ;;  %v274_v9 = vld [vmem:[%s808_s2 + $0x8] sm:$0xff]  ;;  %vm256_vm3 = vcmask 122880   ;;  %s205_s9 = scalar_lea.vmem [#allocation8], %s742_s19  ;;  %s370_s11 = sshll.u32 %s366_s8, 4  ;;  %s371_s11 = int_to_ptr.hbm [resolvable:$true] %s370_s11 }
  0x24   : > { %v230_v6 = vmax.f32 %v220_v4, %v226_v5  ;;  %v228_v7 = vadd.f32 %v226_v5, %v220_v4  ;;  %v272_v8 = vld [vmem:[%s807_s1] sm:$0x3]  ;;  %458 = vmatpush.xpose.msk.msra.mxu1 %vm303_vm1, %v274_v9  ;;  %v249_v13 = vand.u32 127, %v248_v10  ;;  %s368_s10 = sshll.u32 %s205_s9, 4  ;;  %s358_s15 = scalar_lea.sflag [#allocation7], %s742_s19  ;;  %s369_s10 = int_to_ptr.vmem [resolvable:$true] %s368_s10 }
  0x25   : > { %260 = vmax.xlane.f32.xlu1 %v229_v2  ;;  %240 = vadd.xlane.f32.xlu0 %v227_v3  ;;  %v273_v26 = vld [vmem:[%s808_s2] sm:$0xff]  ;;  %s576_s18 = sshra.s32 %s371_s11, 4  ;;  %s582_s22 = scalar_lea.hbm %s809_s3, 2  ;;  %s577_s18 = int_to_ptr.hbm [resolvable:$true] %s576_s18 }
  0x26   : > { %456 = vmatpush.xpose.msk.msra.mxu0 %vm275_vm0, %v272_v8  ;;  %v251_v14 = vadd.s32 4294967288, %v249_v13  ;;  %s578_s21 = scalar_lea.hbm %s577_s18, 1  ;;  %p583_p7 = scmp.lt.s32.totalorder %s577_s18, %s809_s3 }
  0x27   : > { %p579_p4 = scmp.ne.s32.totalorder %s577_s18, %s578_s21  ;;  %p584_p8 = scmp.lt.s32.totalorder %s582_s22, %s578_s21 }
  0x28   : > { %459 = vmatpush.xpose.msk.msra.mxu1 %vm303_vm1, %v273_v26 }
  0x29   : > { %p580_p5 = pnand %p579_p4, %p719_p9  ;;  %p585_p10 = por %p584_p8, %p583_p7 }
  0x2b   : > { %p581_p6 = pneg %p580_p5 }
  0x2d   : > { %262 = vmax.xlane.f32.xlu1 %v230_v6  ;;  %242 = vadd.xlane.f32.xlu0 %v228_v7  ;;  %p586_p13 = pnand %p585_p10, %p581_p6 }
  0x98   : > { %v261_v11 = vpop.xlane.xlu1 %260  ;;  %v241_v12 = vpop.xlane.xlu0 %240 }
  0x99   : > { %v244_v15 = vmul.f32 0.00390625, %v241_v12  ;;  %v266_v18 = vperm.slane %v261_v11, %v249_v13 }
  0x9b   : > { %v250_v21 = vperm.slane %v244_v15, %v249_v13 }
  0xa0   : > { %v263_v16 = vpop.xlane.xlu1 %262  ;;  %v243_v17 = vpop.xlane.xlu0 %242 }
  0xa1   : > { %v267_v19 = vperm.slane %v263_v16, %v251_v14  ;;  %v245_v20 = vmul.f32 0.00390625, %v243_v17 }
  0xa3   : > { %v268_v22 = vsel %vm253_vm2, %v267_v19, %v266_v18  ;;  %v252_v23 = vperm.slane %v245_v20, %v251_v14 }
  0xa4   : > { %270 = vst.msk [vmem:[#allocation4 + $0x1] sm:$0x1] %vm256_vm3, %v268_v22 }
  0xa5   : > { %v254_v24 = vsel %vm253_vm2, %v252_v23, %v250_v21 }
  0xa6   : > { %257 = vst.msk [vmem:[#allocation4] sm:$0x1] %vm256_vm3, %v254_v24 }
  0xad   : > { %v271_v25 = vld [vmem:[#allocation4] sm:$0x3] }
  0xae   : > { %457 = vmatmul.msk.f32.vlgmr.msra.gmra.mxu0 %vm275_vm0, %v271_v25 }
 0x12b   : > { %v299_v27 = vpop.f32.mrf.mxu0 }
 0x12c   : > { %v302_v28 = vmax.f32 %v299_v27, 0.0 }
 0x12e   : > { %460 = vmatmul.msk.f32.vlgmr.msra.gmra.mxu1 %vm303_vm1, %v302_v28 }
 0x1ab   : > { %v330_v29 = vpop.f32.mrf.mxu1 }
 0x1ac   : > { %v334_v30 = vrot.slane %v330_v29, 1 }
 0x1ae   : > { %v336_v31 = vadd.f32 %v334_v30, %v330_v29 }
 0x1b0   : > { %v337_v32 = vsub.f32 0.0, %v336_v31 }
 0x1b2   : > { %v338_v33 = vmul.f32 1.442695, %v337_v32 }
 0x1b4   : > { %528 = vpow2.f32 %v338_v33 }
 0x1ba   : > { %v529_v34 = vpop.eup %528 }
 0x1bb   : > { %v340_v35 = vadd.f32 1.0, %v529_v34 }
 0x1bd   : > { %530 = vrcp.f32 %v340_v35  ;;  %v352_v39 = vand.u32 2147483648, %v340_v35  ;;  %v350_v41 = vand.u32 2147483647, %v340_v35  ;;  %vm346_vm5 = vweird.f32 %v340_v35 }
 0x1bf   : > { %v353_v43 = vor.u32 1.1754944e-38, %v352_v39  ;;  %vm351_vm7 = vcmp.eq.f32.partialorder %v350_v41, 8.507059e+37 }
 0x1c3   : > { %v531_v36 = vpop.eup %530 }
 0x1c4   : > { %v342_v37 = vmul.f32 %v531_v36, %v340_v35  ;;  %vm347_vm4 = vweird.f32 %v531_v36 }
 0x1c5   : > { %vm348_vm6 = vmor %vm346_vm5, %vm347_vm4 }
 0x1c6   : > { %v343_v38 = vsub.f32 1.0, %v342_v37 }
 0x1c8   : > { %v344_v40 = vmul.f32 %v531_v36, %v343_v38 }
 0x1ca   : > { %v345_v42 = vadd.f32 %v531_v36, %v344_v40 }
 0x1cc   : > { %v349_v44 = vsel %vm348_vm6, %v531_v36, %v345_v42 }
 0x1cd   : > { %v354_v45 = vsel %vm351_vm7, %v353_v43, %v349_v44 }
 0x1ce   : > { %356 = vst.msk [vmem:[%s205_s9] sm:$0x1] %vm256_vm3, %v354_v45 }
 0x1cf   : > { %589 = shalt.err (!%p586_p13)
}
 0x1d0   : > { %466 = dma.vmem_to_hbm [thread:$0]  (%p719_p9), %s369_s10, 16, %s371_s11, %s358_s15  }
 0x1d1 PF: > { %s382_s19 = sand.u32 1, %s624_s12   ;;  %p473_p0 = pnand %p450_p12, %p726_p11 }
 0x1d2   : > { %s383_s30 = scalar_lea.sflag [#allocation7], %s382_s19 }
 0x1d3   : > { %p474_p1 = pneg %p473_p0 }
 0x1d5   : > { %619 = dma.done.wait (%p474_p1), %s383_s30, 16  }
 0x1d6   : > { %621 = vsyncadd (%p474_p1), %s383_s30, 4294967280  ;;  %s19_s17 = sadd.s32 1, %s644_s17   ;;  %s814_s12 = smov %s628_s13 }
 0x1d7   : > { %p16_p2 = scmp.ge.s32.totalorder %s19_s17, 4   ;;  %s815_s13 = smov %s632_s14 }
 0x1d8   : > { %s816_s14 = smov %s724_s26  ;;  %s817_s15 = smov %s640_s16 }
 0x1d9   : > { %s818_s16 = smov %s820_s20  ;;  %18 = sbr.rel (!%p16_p2) target bundleno = 6 (0x6), region = 85 }
 0x1de   :  { %388 = vsyncpa [#allocation6], 1 }
 0x1df   :  { %390 = vsyncpa [#allocation6 + $0x1], 1 }
 0x1e0   :  { %391 = vsyncpa [#allocation7], 1 }
 0x1e1   :  { %393 = vsyncpa [#allocation7 + $0x1], 1 }

</bundles_post_ra>
